<compile_context>
chip_gen: v6e
topology: v6e:2x2x1
jax: 0.10.0
libtpu: 0.0.40
codegen_flags: <defaults>
</compile_context>

<pallas_src>
import functools
import numpy as np
import jax
import jax.numpy as jnp
from jax.experimental import pallas as pl
from jax.experimental.pallas import tpu as pltpu


def _round_up(x, m):
    return (x + m - 1) // m * m


def _pick_tile(dim_padded, cap):
    """Largest multiple of 128 that divides dim_padded and is <= cap."""
    best = 128
    t = 128
    while t <= cap:
        if dim_padded % t == 0:
            best = t
        t += 128
    return best


# ---------------------------------------------------------------------------
# Pallas kernels
# ---------------------------------------------------------------------------

def _matmul_affine_kernel(a_ref, b_ref, scale_ref, bias_ref, *rest,
                          relu, has_residual):
    if has_residual:
        res_ref, o_ref, acc_ref = rest
    else:
        o_ref, acc_ref = rest

    k = pl.program_id(2)

    @pl.when(k == 0)
    def _():
        acc_ref[...] = jnp.zeros_like(acc_ref)

    # bf16 x bf16 -> f32 accumulate on the MXU.
    acc_ref[...] += jnp.dot(a_ref[...], b_ref[...],
                            preferred_element_type=jnp.float32)

    @pl.when(k == pl.num_programs(2) - 1)
    def _():
        out = acc_ref[...] * scale_ref[...] + bias_ref[...]
        if has_residual:
            out = out + res_ref[...].astype(jnp.float32)
        if relu:
            out = jnp.maximum(out, 0.0)
        o_ref[...] = out.astype(o_ref.dtype)


def matmul_affine(a, b, scale, bias, *, relu, residual=None,
                  out_dtype=jnp.bfloat16):
    """maybe_relu((a @ b) * scale + bias [+ residual]).

    scale/bias broadcast over rows (per output column). a is cast to bf16,
    b is expected bf16 (pre-cast weights); accumulation/epilogue are f32."""
    M, K = a.shape
    Kb, N = b.shape
    assert K == Kb
    Kp = _round_up(K, 128)
    Np = _round_up(N, 128)
    tm = 256 if M >= 256 else _round_up(M, 8)
    Mp = _round_up(M, tm)
    tn = _pick_tile(Np, 256)
    tk = _pick_tile(Kp, 1024)

    a_p = a.astype(jnp.bfloat16)
    if (Mp, Kp) != (M, K):
        a_p = jnp.pad(a_p, ((0, Mp - M), (0, Kp - K)))
    b_p = b.astype(jnp.bfloat16)
    if (Kp, Np) != (K, N):
        b_p = jnp.pad(b_p, ((0, Kp - K), (0, Np - N)))
    s_p = scale.astype(jnp.float32)
    z_p = bias.astype(jnp.float32)
    if Np != N:
        s_p = jnp.pad(s_p, (0, Np - N))
        z_p = jnp.pad(z_p, (0, Np - N))
    s_p = s_p.reshape(1, Np)
    z_p = z_p.reshape(1, Np)

    in_specs = [
        pl.BlockSpec((tm, tk), lambda i, j, k: (i, k)),
        pl.BlockSpec((tk, tn), lambda i, j, k: (k, j)),
        pl.BlockSpec((1, tn), lambda i, j, k: (0, j)),
        pl.BlockSpec((1, tn), lambda i, j, k: (0, j)),
    ]
    inputs = [a_p, b_p, s_p, z_p]
    has_residual = residual is not None
    if has_residual:
        r_p = residual.astype(jnp.bfloat16)
        if (Mp, Np) != residual.shape:
            r_p = jnp.pad(r_p, ((0, Mp - M), (0, Np - N)))
        in_specs.append(pl.BlockSpec((tm, tn), lambda i, j, k: (i, j)))
        inputs.append(r_p)

    grid = (Mp // tm, Np // tn, Kp // tk)

    out = pl.pallas_call(
        functools.partial(_matmul_affine_kernel, relu=relu,
                          has_residual=has_residual),
        out_shape=jax.ShapeDtypeStruct((Mp, Np), out_dtype),
        grid_spec=pltpu.PrefetchScalarGridSpec(
            num_scalar_prefetch=0,
            grid=grid,
            in_specs=in_specs,
            out_specs=pl.BlockSpec((tm, tn), lambda i, j, k: (i, j)),
            scratch_shapes=[pltpu.VMEM((tm, tn), jnp.float32)],
        ),
        compiler_params=pltpu.CompilerParams(
            dimension_semantics=("parallel", "parallel", "arbitrary"),
        ),
    )(*inputs)
    return out[:M, :N]


def _max_reduce_kernel(x_ref, o_ref):
    # x block: (tm, 9, C) -> max over the 9 pooling taps.
    o_ref[...] = jnp.max(x_ref[...], axis=1)


def _mean_reduce_kernel(x_ref, o_ref):
    # x block: (1, H*W, C) -> f32 mean over the spatial axis.
    o_ref[...] = jnp.mean(x_ref[...].astype(jnp.float32), axis=1)


# ---------------------------------------------------------------------------
# Conv / pool wrappers (thin JAX glue, compute in Pallas)
# ---------------------------------------------------------------------------

def _extract_patches(x, kh, kw, stride, pad, pad_value=0.0):
    """x: (N,H,W,C) -> (N, Ho, Wo, kh*kw*C) patches in (dy, dx, c) order."""
    N, H, W, C = x.shape
    Ho = (H + 2 * pad - kh) // stride + 1
    Wo = (W + 2 * pad - kw) // stride + 1
    xp = jnp.pad(x, ((0, 0), (pad, pad), (pad, pad), (0, 0)),
                 constant_values=pad_value)
    patches = []
    for dy in range(kh):
        for dx in range(kw):
            patches.append(
                xp[:, dy:dy + stride * (Ho - 1) + 1:stride,
                      dx:dx + stride * (Wo - 1) + 1:stride, :])
    return jnp.concatenate(patches, axis=-1), Ho, Wo


def conv_bn(x, w2d, ksize, stride, pad, scale, bias, relu, residual=None,
            out_dtype=jnp.bfloat16):
    """Conv2d (no bias) + folded BN affine + optional fused residual + ReLU.

    x: (N,H,W,Cin) bf16, w2d: (ksize*ksize*Cin, Cout) bf16."""
    N, H, W, Cin = x.shape
    cout = w2d.shape[1]
    if ksize == 1:
        # Pointwise conv: no im2col; just (strided) reshape.
        if stride != 1:
            x = x[:, ::stride, ::stride, :]
        _, Ho, Wo, _ = x.shape
        a = x.reshape(N * Ho * Wo, Cin)
    else:
        patches, Ho, Wo = _extract_patches(x, ksize, ksize, stride, pad)
        a = patches.reshape(N * Ho * Wo, ksize * ksize * Cin)

    res2d = None
    if residual is not None:
        res2d = residual.reshape(N * Ho * Wo, cout)

    out = matmul_affine(a, w2d, scale, bias, relu=relu, residual=res2d,
                        out_dtype=out_dtype)
    return out.reshape(N, Ho, Wo, cout)


def maxpool3x3_s2(x):
    N, H, W, C = x.shape
    patches, Ho, Wo = _extract_patches(x, 3, 3, 2, 1, pad_value=-jnp.inf)
    M = N * Ho * Wo
    stacked = patches.reshape(M, 9, C)      # tap axis in the middle; no transpose
    tm = 256 if M >= 256 else _round_up(M, 8)
    Mp = _round_up(M, tm)
    if Mp != M:
        stacked = jnp.pad(stacked, ((0, Mp - M), (0, 0), (0, 0)),
                          constant_values=-jnp.inf)
    out = pl.pallas_call(
        _max_reduce_kernel,
        out_shape=jax.ShapeDtypeStruct((Mp, C), x.dtype),
        grid=(Mp // tm,),
        in_specs=[pl.BlockSpec((tm, 9, C), lambda i: (i, 0, 0))],
        out_specs=pl.BlockSpec((tm, C), lambda i: (i, 0)),
        compiler_params=pltpu.CompilerParams(
            dimension_semantics=("parallel",)),
    )(stacked)
    return out[:M].reshape(N, Ho, Wo, C)


def global_avgpool(x):
    N, H, W, C = x.shape
    xf = x.reshape(N, H * W, C)
    return pl.pallas_call(
        _mean_reduce_kernel,
        out_shape=jax.ShapeDtypeStruct((N, C), jnp.float32),
        grid=(N,),
        in_specs=[pl.BlockSpec((1, H * W, C), lambda i: (i, 0, 0))],
        out_specs=pl.BlockSpec((1, C), lambda i: (i, 0)),
        compiler_params=pltpu.CompilerParams(
            dimension_semantics=("parallel",)),
    )(xf)


# ---------------------------------------------------------------------------
# Deterministic parameter construction (synthetic, He-style init)
# ---------------------------------------------------------------------------

class _KeyGen:
    def __init__(self, key):
        self.key = key
        self.i = 0

    def __call__(self):
        self.i += 1
        return jax.random.fold_in(self.key, self.i)


def _bn_fold(key, c, eps=1e-5):
    k1, k2, k3 = jax.random.split(key, 3)
    gamma = 1.0 + 0.1 * jax.random.normal(k1, (c,), jnp.float32)
    beta = 0.1 * jax.random.normal(k2, (c,), jnp.float32)
    mean = 0.1 * jax.random.normal(k3, (c,), jnp.float32)
    var = jnp.ones((c,), jnp.float32)
    scale = gamma / jnp.sqrt(var + eps)
    bias = beta - mean * scale
    return scale, bias


def _conv_params(key, cin, cout, k):
    kw_key, bn_key = jax.random.split(key)
    std = np.sqrt(2.0 / (cin * k * k))
    w = jax.random.normal(kw_key, (k, k, cin, cout), jnp.float32) * std
    scale, bias = _bn_fold(bn_key, cout)
    return {
        # pre-reshaped (K, Cout), pre-cast to bf16 once at init time
        'w2d': w.reshape(k * k * cin, cout).astype(jnp.bfloat16),
        'k': k,
        'scale': scale,
        'bias': bias,
    }


def init_resnet50_params(key, num_classes):
    kg = _KeyGen(key)
    P = {}
    P['stem'] = _conv_params(kg(), 3, 64, 7)

    inplanes = 64
    layers = []
    for planes, nblocks, stride in [(64, 3, 1), (128, 4, 2), (256, 6, 2), (512, 3, 2)]:
        blocks = []
        for b in range(nblocks):
            s = stride if b == 0 else 1
            blk = {'stride': s}
            blk['conv1'] = _conv_params(kg(), inplanes, planes, 1)
            blk['conv2'] = _conv_params(kg(), planes, planes, 3)
            blk['conv3'] = _conv_params(kg(), planes, planes * 4, 1)
            if s != 1 or inplanes != planes * 4:
                blk['down'] = _conv_params(kg(), inplanes, planes * 4, 1)
            inplanes = planes * 4
            blocks.append(blk)
        layers.append(blocks)
    P['layers'] = layers

    P['fc_w'] = (jax.random.normal(kg(), (2048, num_classes), jnp.float32)
                 / np.sqrt(2048.0)).astype(jnp.bfloat16)
    P['fc_b'] = 0.01 * jax.random.normal(kg(), (num_classes,), jnp.float32)
    return P


# ---------------------------------------------------------------------------
# Forward pass (matches torchvision resnet50 with replaced fc head)
# ---------------------------------------------------------------------------

def _bottleneck(x, blk):
    s = blk['stride']
    if 'down' in blk:
        d = blk['down']
        identity = conv_bn(x, d['w2d'], d['k'], s, 0, d['scale'], d['bias'],
                           relu=False)
    else:
        identity = x
    c1, c2, c3 = blk['conv1'], blk['conv2'], blk['conv3']
    out = conv_bn(x, c1['w2d'], c1['k'], 1, 0, c1['scale'], c1['bias'], relu=True)
    out = conv_bn(out, c2['w2d'], c2['k'], s, 1, c2['scale'], c2['bias'], relu=True)
    # Residual add + ReLU fused into the conv3 matmul epilogue.
    out = conv_bn(out, c3['w2d'], c3['k'], 1, 0, c3['scale'], c3['bias'],
                  relu=True, residual=identity)
    return out


def resnet50_forward(params, x_nchw):
    # PyTorch inputs are NCHW; transpose to NHWC (bf16) for the TPU kernels.
    x = jnp.transpose(x_nchw, (0, 2, 3, 1)).astype(jnp.bfloat16)
    st = params['stem']
    x = conv_bn(x, st['w2d'], st['k'], 2, 3, st['scale'], st['bias'], relu=True)
    x = maxpool3x3_s2(x)
    for blocks in params['layers']:
        for blk in blocks:
            x = _bottleneck(x, blk)
    pooled = global_avgpool(x)                          # (N, 2048) f32
    num_classes = params['fc_b'].shape[0]
    logits = matmul_affine(pooled, params['fc_w'],
                           jnp.ones((num_classes,), jnp.float32),
                           params['fc_b'], relu=False, out_dtype=jnp.float32)
    return logits                                       # (N, num_classes)


# ---------------------------------------------------------------------------

if __name__ == "__main__":
    num_classes = 10
    key = jax.random.PRNGKey(0)
    k_params, k_input = jax.random.split(key)

    params = init_resnet50_params(k_params, num_classes)
    # Smallest spatial size compatible with ResNet-50's 32x total downsampling.
    x = jax.random.normal(k_input, (2, 3, 32, 32), jnp.float32)

    logits = resnet50_forward(params, x)
    logits = jax.block_until_ready(logits)

    assert logits.shape == (2, num_classes)
    assert bool(jnp.all(jnp.isfinite(logits)))
    print("KERNEL_OK")
</pallas_src>

<mosaic_0001>
module attributes {stable_mosaic.version = 11 : i64} {
  func.func @_matmul_affine_kernel(%arg0: i32, %arg1: i32, %arg2: i32, %arg3: memref<256x256xbf16, #tpu.memory_space<vmem>>, %arg4: memref<256x128xbf16, #tpu.memory_space<vmem>>, %arg5: memref<1x128xf32, #tpu.memory_space<vmem>>, %arg6: memref<1x128xf32, #tpu.memory_space<vmem>>, %arg7: memref<256x128xbf16, #tpu.memory_space<vmem>>, %arg8: memref<256x128xf32, #tpu.memory_space<vmem>>) attributes {dimension_semantics = [#tpu.dimension_semantics<parallel>, #tpu.dimension_semantics<parallel>, #tpu.dimension_semantics<arbitrary>], iteration_bounds = array<i64: 2, 1, 1>, scalar_prefetch = 0 : i64, scratch_operands = 1 : i64, tpu.core_type = #tpu.core_type<tc>, window_params = [{transform_indices = @transform_0, window_bounds = array<i64: 256, 256>}, {transform_indices = @transform_1, window_bounds = array<i64: 256, 128>}, {transform_indices = @transform_2, window_bounds = array<i64: 1, 128>}, {transform_indices = @transform_3, window_bounds = array<i64: 1, 128>}, {transform_indices = @transform_4, window_bounds = array<i64: 256, 128>}]} {
    %c0_i32 = arith.constant 0 : i32
    %0 = arith.cmpi eq, %arg2, %c0_i32 : i32
    %1 = arith.extui %0 : i1 to i32
    %c0_i32_0 = arith.constant 0 : i32
    %2 = arith.cmpi ne, %1, %c0_i32_0 : i32
    scf.if %2 {
      %cst_10 = arith.constant 0.000000e+00 : f32
      %12 = vector.broadcast %cst_10 : f32 to vector<256x128xf32>
      %c0_11 = arith.constant 0 : index
      %c0_12 = arith.constant 0 : index
      %13 = vector.load %arg8[%c0_11, %c0_12] : memref<256x128xf32, #tpu.memory_space<vmem>>, vector<256x128xf32>
      tpu.vector_store %arg8[%c0_11, %c0_12], %12 {strides = array<i32>} : memref<256x128xf32, #tpu.memory_space<vmem>>, vector<256x128xf32>,
    } else {
    }
    %c0 = arith.constant 0 : index
    %c0_1 = arith.constant 0 : index
    %3 = vector.load %arg8[%c0, %c0_1] : memref<256x128xf32, #tpu.memory_space<vmem>>, vector<256x128xf32>
    %c0_2 = arith.constant 0 : index
    %c0_3 = arith.constant 0 : index
    %4 = vector.load %arg3[%c0_2, %c0_3] : memref<256x256xbf16, #tpu.memory_space<vmem>>, vector<256x256xbf16>
    %c0_4 = arith.constant 0 : index
    %c0_5 = arith.constant 0 : index
    %5 = vector.load %arg4[%c0_4, %c0_5] : memref<256x128xbf16, #tpu.memory_space<vmem>>, vector<256x128xbf16>
    %cst = arith.constant dense<0.000000e+00> : vector<256x128xf32>
    %6 = tpu.matmul %4, %5, %cst {dimension_numbers = #tpu.dot_dimension_numbers<[1], [0], [0], [1], [0, 0, 1, 1], [], []>} : vector<256x256xbf16>, vector<256x128xbf16>, vector<256x128xf32> -> vector<256x128xf32>
    %7 = arith.addf %3, %6 : vector<256x128xf32>
    %c0_6 = arith.constant 0 : index
    %c0_7 = arith.constant 0 : index
    %8 = vector.load %arg8[%c0_6, %c0_7] : memref<256x128xf32, #tpu.memory_space<vmem>>, vector<256x128xf32>
    tpu.vector_store %arg8[%c0_6, %c0_7], %7 {strides = array<i32>} : memref<256x128xf32, #tpu.memory_space<vmem>>, vector<256x128xf32>,
    %c0_i32_8 = arith.constant 0 : i32
    %9 = arith.cmpi eq, %arg2, %c0_i32_8 : i32
    %10 = arith.extui %9 : i1 to i32
    %c0_i32_9 = arith.constant 0 : i32
    %11 = arith.cmpi ne, %10, %c0_i32_9 : i32
    scf.if %11 {
      %c0_10 = arith.constant 0 : index
      %c0_11 = arith.constant 0 : index
      %12 = vector.load %arg8[%c0_10, %c0_11] : memref<256x128xf32, #tpu.memory_space<vmem>>, vector<256x128xf32>
      %c0_12 = arith.constant 0 : index
      %c0_13 = arith.constant 0 : index
      %13 = vector.load %arg5[%c0_12, %c0_13] : memref<1x128xf32, #tpu.memory_space<vmem>>, vector<1x128xf32>
      %14 = vector.broadcast %13 : vector<1x128xf32> to vector<256x128xf32>
      %15 = arith.mulf %12, %14 : vector<256x128xf32>
      %c0_14 = arith.constant 0 : index
      %c0_15 = arith.constant 0 : index
      %16 = vector.load %arg6[%c0_14, %c0_15] : memref<1x128xf32, #tpu.memory_space<vmem>>, vector<1x128xf32>
      %17 = vector.broadcast %16 : vector<1x128xf32> to vector<256x128xf32>
      %18 = arith.addf %15, %17 : vector<256x128xf32>
      %cst_16 = arith.constant 0.000000e+00 : f32
      %19 = vector.broadcast %cst_16 : f32 to vector<256x128xf32>
      %20 = arith.maximumf %18, %19 : vector<256x128xf32>
      %21 = arith.truncf %20 : vector<256x128xf32> to vector<256x128xbf16>
      %c0_17 = arith.constant 0 : index
      %c0_18 = arith.constant 0 : index
      %22 = vector.load %arg7[%c0_17, %c0_18] : memref<256x128xbf16, #tpu.memory_space<vmem>>, vector<256x128xbf16>
      tpu.vector_store %arg7[%c0_17, %c0_18], %21 {strides = array<i32>} : memref<256x128xbf16, #tpu.memory_space<vmem>>, vector<256x128xbf16>,
    } else {
    }
    return
  }
  func.func @transform_0(%arg0: i32, %arg1: i32, %arg2: i32) -> (i32, i32) {
    %c0_i32 = arith.constant 0 : i32
    return %arg0, %arg2 : i32, i32
  }
  func.func @transform_1(%arg0: i32, %arg1: i32, %arg2: i32) -> (i32, i32) {
    %c0_i32 = arith.constant 0 : i32
    return %arg2, %arg1 : i32, i32
  }
  func.func @transform_2(%arg0: i32, %arg1: i32, %arg2: i32) -> (i32, i32) {
    %c0_i32 = arith.constant 0 : i32
    %c0_i32_0 = arith.constant 0 : i32
    return %c0_i32, %arg1 : i32, i32
  }
  func.func @transform_3(%arg0: i32, %arg1: i32, %arg2: i32) -> (i32, i32) {
    %c0_i32 = arith.constant 0 : i32
    %c0_i32_0 = arith.constant 0 : i32
    return %c0_i32, %arg1 : i32, i32
  }
  func.func @transform_4(%arg0: i32, %arg1: i32, %arg2: i32) -> (i32, i32) {
    %c0_i32 = arith.constant 0 : i32
    return %arg0, %arg1 : i32, i32
  }
}

</mosaic_0001>

<bundles_post_ra>
// kernel: tpu_custom_call.1
= control target key start
LH: loop header
LB: loop body
LE: loop exit
PB: predicated region body
PF: predicated region fallthrough
CT: control target
= control target key end

     0   :  { %s2347_s0 = inlined_call_operand.hbm [shape: bf16[512,256], index: 0, kind: input, shape index: {}]   ;;  %s2348_s1 = inlined_call_operand.hbm [shape: bf16[256,128], index: 1, kind: input, shape index: {}]   ;;  %s2349_s2 = inlined_call_operand.vmem [shape: f32[1,128], index: 2, kind: input, shape index: {}]   ;;  %s2350_s3 = inlined_call_operand.vmem [shape: f32[1,128], index: 3, kind: input, shape index: {}]   ;;  %s2351_s4 = inlined_call_operand.hbm [shape: bf16[512,128], index: 4, kind: output, shape index: {}]  }
   0x1   :  { %2353 = sst [smem:[#allocation12_spill]] %s2348_s1 }
   0x2   :  { %9 = vsyncpa [#allocation4], 0 }
   0x3   :  { %11 = vsyncpa [#allocation4 + $0x1], 0 }
   0x4   :  { %12 = vsyncpa [#allocation7], 0 }
   0x5   :  { %13 = vsyncpa [#allocation5], 0 }
   0x6   :  { %15 = vsyncpa [#allocation5 + $0x1], 0  ;;  %s2038_s15 = smov 0   ;;  %s2040_s16 = smov 0  }
   0x7   :  { %s2042_s17 = smov 0   ;;  %s2044_s18 = smov 0  }
   0x8   :  { %s2046_s19 = smov 0   ;;  %s2048_s20 = smov 0  }
   0x9 LB: > { %s1361_s21 = sadd.s32 4294967295, %s2002_s20   ;;  %s1362_s22 = sadd.s32 4294967294, %s2002_s20   ;;  %s2002_s20 = sphi %s2048_s20, %s21_s20   ;;  %s1998_s19 = sphi %s2046_s19, %s2371_s19   ;;  %s1994_s18 = sphi %s2044_s18, %s2370_s18   ;;  %s1990_s17 = sphi %s2042_s17, %s2369_s17   ;;  %s1986_s16 = sphi %s2040_s16, %s2368_s16   ;;  %s1982_s15 = sphi %s2038_s15, %s2367_s15  }
   0xa   : > { %p62_p0 = scmp.ne.s32.totalorder %s1986_s16, %s1982_s15  ;;  %p2072_p1 = scmp.eq.s32.totalorder %s1361_s21, 0 }
   0xb   : > { %p2076_p2 = scmp.eq.s32.totalorder %s1361_s21, 1  ;;  %p174_p3 = scmp.eq.s32.totalorder %s1362_s22, 1 }
   0xc   : > { %p2082_p4 = por %p2072_p1, %p62_p0  ;;  %p1363_p5 = scmp.ge.s32.totalorder %s2002_s20, 1 }
   0xd   : > { %p2087_p6 = por %p174_p3, %p62_p0  ;;  %p181_p7 = scmp.lt.s32.totalorder %s2002_s20, 3 }
   0xe   : > { %s2356_s25 = scalar_select %p2082_p4, 1, 0 }
   0xf   : > { %s2357_s26 = scalar_select %p2087_p6, 1, 0 }
  0x10   : > { %p2092_p8 = pnand %p1363_p5, %p181_p7  ;;  %s2004_s28 = smov [#allocation6]  }
  0x11   : > { %s197_s29 = sshll.u32 %s2004_s28, 4  ;;  %s40_s5 = sadd.s32 1, %s1998_s19  ;;  %s198_s29 = int_to_ptr.vmem [resolvable:$true] %s197_s29 }
  0x12   : > { %p1729_p9 = pneg %p2092_p8  ;;  %s1875_s6 = scalar_lea.vmem %s198_s29, 2048 }
  0x13   : > { %p1876_p13 = scmp.ne.s32.totalorder %s198_s29, %s1875_s6  ;;  %p1883_p5 = scmp.lt.s32.totalorder %s198_s29, %s198_s29 }
  0x14   : > { %p2101_p11 = pnand %p1729_p9, %p2072_p1  ;;  %p1884_p7 = scmp.lt.s32.totalorder %s1875_s6, %s1875_s6 }
  0x16   : > { %p1866_p12 = pneg %p2101_p11  ;;  %p1885_p6 = por %p1884_p7, %p1883_p5 }
  0x18   : > { %p1878_p0 = pnand %p1876_p13, %p1866_p12 }
  0x1a   : > { %p1879_p3 = pneg %p1878_p0 }
  0x1c   : > { %p1886_p4 = pnand %p1885_p6, %p1879_p3 }
  0x1e   : > { %1889 = shalt.err (!%p1886_p4)
}
  0x1f   : > { %s2005_s7 = smov 64   ;;  %s2006_s8 = smov 4  }
  0x20   : > { %s2360_s1 = sld [smem:[#allocation12_spill]]  ;;  %p42_p6 = scmp.ge.s32.totalorder %s40_s5, 2 }
  0x21   : > { %s49_s11 = sadd.s32 1, %s1990_s17  ;;  %p56_p4 = scmp.ne.s32.totalorder %s1990_s17, %s1986_s16 }
  0x22   : > { %p57_p9 = scmp.eq.s32.totalorder %s2002_s20, 0  ;;  %s2373_s5 = smov (%p42_p6, %s40_s5), 0 }
  0x23   : > { %p2125_p13 = por %p2076_p2, %p56_p4  ;;  %s44_s14 = ssub.s32 %s1998_s19, %s2373_s5 }
  0x24   : > { %p2119_p12 = por %p57_p9, %p56_p4  ;;  %p1742_p0 = scmp.lt.s32.totalorder %s2002_s20, 2 }
  0x25   : > { %s223_s21 = sand.u32 1, %s1990_s17  }
  0x26   : > { %1732 = dma.hbm_to_vmem [thread:$0]  (!%p2101_p11), %s2360_s1, 2048, %s198_s29, [#allocation7], %s2005_s7, %s2005_s7, %s2006_s8  }
  0x27   : > { %p47_p11 = scmp.eq.s32.totalorder %s44_s14, 0  ;;  %s1368_s22 = sshll.u32 %s223_s21, 8 }
  0x28   : > { %s1464_s29 = sshll.u32 %s1998_s19, 12  ;;  %s227_s8 = scalar_lea.vmem [#allocation3], %s1368_s22 }
  0x29   : > { %s2134_s28 = scalar_select %p47_p11, %s1990_s17, %s49_s11  }
  0x2a   : > { %s236_s7 = scalar_lea.hbm %s2347_s0, %s1464_s29  ;;  %s237_s9 = sshll.u32 %s227_s8, 4  ;;  %s238_s9 = int_to_ptr.vmem [resolvable:$true] %s237_s9 }
  0x2b   : > { %p2142_p2 = pnand %p1742_p0, %p2119_p12  ;;  %s224_s10 = scalar_lea.sflag [#allocation4], %s223_s21 }
  0x2c   : > { %s1903_s14 = scalar_lea.vmem %s238_s9, 4096  ;;  %s2007_s11 = smov [#allocation3]  }
  0x2d   : > { %p1892_p3 = pneg %p2142_p2  ;;  %p1904_p5 = scmp.ne.s32.totalorder %s238_s9, %s1903_s14 }
  0x2e   : > { %s1908_s1 = sshll.u32 %s2007_s11, 4  ;;  %s1909_s1 = int_to_ptr.vmem [resolvable:$false] %s1908_s1 }
  0x2f   : > { %p1906_p7 = pnand %p1904_p5, %p1892_p3  ;;  %s1910_s29 = scalar_lea.vmem %s1909_s1, 8192 }
  0x30   : > { %p1911_p4 = scmp.lt.s32.totalorder %s238_s9, %s1909_s1  ;;  %p1912_p9 = scmp.lt.s32.totalorder %s1910_s29, %s1903_s14 }
  0x31   : > { %p1907_p6 = pneg %p1906_p7 }
  0x32   : > { %p1913_p11 = por %p1912_p9, %p1911_p4 }
  0x34   : > { %p1914_p10 = pnand %p1913_p11, %p1907_p6 }
  0x36   : > { %1917 = shalt.err (!%p1914_p10)
}
  0x37   : > { %s2008_s12 = smov 128   ;;  %s2009_s22 = smov 8  }
  0x38   : > { %1736 = dma.hbm_to_vmem [thread:$0]  (!%p2142_p2), %s236_s7, 4096, %s238_s9, %s224_s10, %s2008_s12, %s2008_s12, %s2009_s22  }
  0x39   : > { %249 = sbr.rel (%p2092_p8) target bundleno = 377 (0x179), region = 36  ;;  %s2153_s21 = sand.u32 (!%p2092_p8), 1, %s1986_s16  }
  0x3a   : > { %s1373_s30 = sshll.u32 (!%p2092_p8), %s2153_s21, 8  ;;  %s252_s1 = scalar_lea.sflag (!%p2092_p8), [#allocation4], %s2153_s21 }
  0x3b   : > { %s2157_s6 = scalar_lea.vmem (!%p2092_p8), [#allocation3], %s1373_s30  ;;  %p2364_p12 = scmp.ne.s32.totalorder (!%p2092_p8), %s2356_s25, 0 }
  0x3e   : > { %1969 = dma.done.wait (%p2364_p12), %s252_s1, 4096  }
  0x3f   : > { %1971 = vsyncadd (%p2364_p12), %s252_s1, 4294963200 }
  0x40   : > { %1973 = dma.done.wait (%p2072_p1), [#allocation7], 2048  }
  0x41   : > { %1975 = vsyncadd (%p2072_p1), [#allocation7], 4294965248  ;;  %v1800_v0 = vld [vmem:[#allocation6 + $0x78] sm:$0xff]   ;;  %v1802_v2 = vld [vmem:[#allocation6 + $0x70] sm:$0xff]   ;;  %s1375_s8 = sshll.u32 %s2153_s21, 7  ;;  %s1497_s24 = sshll.u32 %s1994_s18, 11 }
  0x42   : > { %v1801_v1 = vld [vmem:[#allocation6 + $0x38] sm:$0xff]   ;;  %1593 = vmatprep.subr.bf16.mxu0 %v1800_v0  ;;  %1705 = vmatprep.subr.bf16.mxu1 %v1800_v0  ;;  %v1803_v3 = vld [vmem:[#allocation6 + $0x30] sm:$0xff]   ;;  %v1804_v4 = vld [vmem:[#allocation6 + $0x68] sm:$0xff]   ;;  %s2220_s9 = scalar_lea.vmem [#allocation8], %s1375_s8  ;;  %s2295_s29 = scalar_lea.hbm %s2351_s4, %s1497_s24 }
  0x43   : > { %1594 = vmatpush3.bf16.msra.mxu0 %v1801_v1  ;;  %1713 = vmatpush3.bf16.msra.mxu1 %v1801_v1  ;;  %v1805_v5 = vld [vmem:[#allocation6 + $0x28] sm:$0xff]   ;;  %v1806_v6 = vld [vmem:[#allocation6 + $0x60] sm:$0xff]   ;;  %v1808_v8 = vld [vmem:[#allocation6 + $0x58] sm:$0xff]   ;;  %s1234_s10 = sshll.u32 %s2220_s9, 4  ;;  %s1220_s18 = scalar_lea.sflag [#allocation5], %s2153_s21  ;;  %s2297_s10 = int_to_ptr.vmem [resolvable:$true] %s1234_s10 }
  0x44   : > { %1595 = vmatprep.subr.bf16.mxu0 %v1802_v2  ;;  %1706 = vmatprep.subr.bf16.mxu1 %v1802_v2  ;;  %v1807_v7 = vld [vmem:[#allocation6 + $0x20] sm:$0xff]   ;;  %v1809_v9 = vld [vmem:[#allocation6 + $0x18] sm:$0xff]   ;;  %v1810_v10 = vld [vmem:[#allocation6 + $0x50] sm:$0xff]   ;;  %s1918_s12 = scalar_lea.vmem %s2297_s10, 2048  ;;  %s2010_s22 = smov [#allocation8]  }
  0x45   : > { %v1818_v11 = vld [vmem:[%s2157_s6 + $0x4] ss:$8 sps:$4 sm:$0xff]   ;;  %v1811_v13 = vld [vmem:[#allocation6 + $0x10] sm:$0xff]   ;;  %v1816_v18 = vld [vmem:[%s2157_s6] ss:$8 sps:$4 sm:$0xff]   ;;  %p1919_p1 = scmp.ne.s32.totalorder %s2297_s10, %s1918_s12  ;;  %s1922_s30 = sshll.u32 %s2010_s22, 4  ;;  %s1923_s30 = int_to_ptr.vmem [resolvable:$false] %s1922_s30 }
  0x46   : > { %v1821_v12 = vld [vmem:[%s2157_s6 + $0x84] ss:$8 sps:$4 sm:$0xff]   ;;  %721 = vmatprep.mubr.bf16.mxu0 %v1818_v11  ;;  %v1819_v19 = vld [vmem:[%s2157_s6 + $0x80] ss:$8 sps:$4 sm:$0xff]   ;;  %v1822_v20 = vld [vmem:[%s2157_s6 + $0x14] ss:$8 sps:$4 sm:$0xff]   ;;  %p1925_p0 = scmp.lt.s32.totalorder %s2297_s10, %s1923_s30 }
  0x47   : > { %1596 = vmatpush3.bf16.msra.mxu0 %v1803_v3  ;;  %1714 = vmatpush3.bf16.msra.mxu1 %v1803_v3  ;;  %v1812_v14 = vld [vmem:[#allocation6 + $0x48] sm:$0xff]   ;;  %v1814_v16 = vld [vmem:[#allocation6 + $0x40] sm:$0xff]   ;;  %v1824_v21 = vld [vmem:[%s2157_s6 + $0x94] ss:$8 sps:$4 sm:$0xff]   ;;  %p1920_p8 = pnand %p1919_p1, %p2125_p13  ;;  %s1924_s1 = scalar_lea.vmem %s1923_s30, 4096 }
  0x48   : > { %1597 = vmatprep.subr.bf16.mxu0 %v1804_v4  ;;  %1707 = vmatprep.subr.bf16.mxu1 %v1804_v4  ;;  %v1813_v15 = vld [vmem:[#allocation6 + $0x8] sm:$0xff]   ;;  %v1815_v17 = vld [vmem:[#allocation6] sm:$0xff]   ;;  %v1826_v22 = vld [vmem:[%s2157_s6 + $0x10] ss:$8 sps:$4 sm:$0xff]   ;;  %p1926_p2 = scmp.lt.s32.totalorder %s1924_s1, %s1918_s12 }
  0x49   : > { %785 = vmatprep.mubr.bf16.mxu1 %v1821_v12  ;;  %v1827_v23 = vld [vmem:[%s2157_s6 + $0x90] ss:$8 sps:$4 sm:$0xff]   ;;  %v1828_v24 = vld [vmem:[%s2157_s6 + $0x24] ss:$8 sps:$4 sm:$0xff]   ;;  %v1832_v26 = vld [vmem:[%s2157_s6 + $0x20] ss:$8 sps:$4 sm:$0xff]   ;;  %p1921_p10 = pneg %p1920_p8 }
  0x4a   : > { %v1830_v25 = vld [vmem:[%s2157_s6 + $0xa4] ss:$8 sps:$4 sm:$0xff]   ;;  %v1833_v27 = vld [vmem:[%s2157_s6 + $0xa0] ss:$8 sps:$4 sm:$0xff]   ;;  %v1834_v28 = vld [vmem:[%s2157_s6 + $0x34] ss:$8 sps:$4 sm:$0xff]   ;;  %p1927_p3 = por %p1926_p2, %p1925_p0 }
  0x4b   : > { %1598 = vmatpush3.bf16.msra.mxu0 %v1805_v5  ;;  %1715 = vmatpush3.bf16.msra.mxu1 %v1805_v5  ;;  %v1836_v29 = vld [vmem:[%s2157_s6 + $0xb4] ss:$8 sps:$4 sm:$0xff]   ;;  %v1838_v30 = vld [vmem:[%s2157_s6 + $0x30] ss:$8 sps:$4 sm:$0xff]   ;;  %v1840_v32 = vld [vmem:[%s2157_s6 + $0x44] ss:$8 sps:$4 sm:$0xff]  }
  0x4c   : > { %1599 = vmatprep.subr.bf16.mxu0 %v1806_v6  ;;  %1708 = vmatprep.subr.bf16.mxu1 %v1806_v6  ;;  %v1839_v31 = vld [vmem:[%s2157_s6 + $0xb0] ss:$8 sps:$4 sm:$0xff]   ;;  %v1842_v33 = vld [vmem:[%s2157_s6 + $0xc4] ss:$8 sps:$4 sm:$0xff]   ;;  %v1844_v34 = vld [vmem:[%s2157_s6 + $0x40] ss:$8 sps:$4 sm:$0xff]   ;;  %p1928_p5 = pnand %p1927_p3, %p1921_p10 }
  0x4d   : > { %v1845_v35 = vld [vmem:[%s2157_s6 + $0xc0] ss:$8 sps:$4 sm:$0xff]   ;;  %v1846_v36 = vld [vmem:[%s2157_s6 + $0x54] ss:$8 sps:$4 sm:$0xff]   ;;  %v1850_v38 = vld [vmem:[%s2157_s6 + $0x50] ss:$8 sps:$4 sm:$0xff]  }
  0x4e   : > { %v1848_v37 = vld [vmem:[%s2157_s6 + $0xd4] ss:$8 sps:$4 sm:$0xff]   ;;  %v1851_v39 = vld [vmem:[%s2157_s6 + $0xd0] ss:$8 sps:$4 sm:$0xff]   ;;  %v1852_v40 = vld [vmem:[%s2157_s6 + $0x64] ss:$8 sps:$4 sm:$0xff]  }
  0x4f   : > { %1600 = vmatpush3.bf16.msra.mxu0 %v1807_v7  ;;  %1716 = vmatpush3.bf16.msra.mxu1 %v1807_v7  ;;  %v1854_v41 = vld [vmem:[%s2157_s6 + $0xe4] ss:$8 sps:$4 sm:$0xff]   ;;  %v1856_v42 = vld [vmem:[%s2157_s6 + $0x60] ss:$8 sps:$4 sm:$0xff]   ;;  %v1858_v44 = vld [vmem:[%s2157_s6 + $0x74] ss:$8 sps:$4 sm:$0xff]  }
  0x50   : > { %1601 = vmatprep.subr.bf16.mxu0 %v1808_v8  ;;  %1709 = vmatprep.subr.bf16.mxu1 %v1808_v8  ;;  %v1857_v43 = vld [vmem:[%s2157_s6 + $0xe0] ss:$8 sps:$4 sm:$0xff]   ;;  %v1860_v45 = vld [vmem:[%s2157_s6 + $0xf4] ss:$8 sps:$4 sm:$0xff]   ;;  %v1862_v46 = vld [vmem:[%s2157_s6 + $0x70] ss:$8 sps:$4 sm:$0xff]  }
  0x51   : > { %v1863_v47 = vld [vmem:[%s2157_s6 + $0xf0] ss:$8 sps:$4 sm:$0xff]   ;;  %v2202_v51 = vld [vmem:[%s2349_s2] ss:$0 sm:$0xff] }
  0x52   : > { %v2209_v59 = vld [vmem:[%s2350_s3] ss:$0 sm:$0xff] }
  0x53   : > { %1602 = vmatpush3.bf16.msra.mxu0 %v1809_v9  ;;  %1717 = vmatpush3.bf16.msra.mxu1 %v1809_v9 }
  0x54   : > { %1603 = vmatprep.subr.bf16.mxu0 %v1810_v10  ;;  %1710 = vmatprep.subr.bf16.mxu1 %v1810_v10 }
  0x57   : > { %1604 = vmatpush3.bf16.msra.mxu0 %v1811_v13  ;;  %1718 = vmatpush3.bf16.msra.mxu1 %v1811_v13 }
  0x58   : > { %1605 = vmatprep.subr.bf16.mxu0 %v1812_v14  ;;  %1711 = vmatprep.subr.bf16.mxu1 %v1812_v14 }
  0x5b   : > { %1606 = vmatpush3.bf16.msra.mxu0 %v1813_v15  ;;  %1719 = vmatpush3.bf16.msra.mxu1 %v1813_v15 }
  0x5c   : > { %1607 = vmatprep.subr.bf16.mxu0 %v1814_v16  ;;  %1712 = vmatprep.subr.bf16.mxu1 %v1814_v16 }
  0x5f   : > { %1608 = vmatpush3.bf16.msra.mxu0 %v1815_v17  ;;  %1720 = vmatpush3.bf16.msra.mxu1 %v1815_v17 }
  0x62   : > { %722 = vmatmul.mubr.bf16.vlgmr.msra.gmra.mxu0 %v1816_v18  ;;  %786 = vmatmul.mubr.bf16.vlgmr.msra.gmra.mxu1 %v1819_v19 }
  0x63   : > { %729 = vmatprep.mubr.bf16.mxu0 %v1822_v20  ;;  %793 = vmatprep.mubr.bf16.mxu1 %v1824_v21 }
  0x6a   : > { %730 = vmatmul.mubr.bf16.gmra.mxu0 %v1826_v22  ;;  %794 = vmatmul.mubr.bf16.gmra.mxu1 %v1827_v23 }
  0x6b   : > { %737 = vmatprep.mubr.bf16.mxu0 %v1828_v24  ;;  %801 = vmatprep.mubr.bf16.mxu1 %v1830_v25 }
  0x72   : > { %738 = vmatmul.mubr.bf16.gmra.mxu0 %v1832_v26  ;;  %802 = vmatmul.mubr.bf16.gmra.mxu1 %v1833_v27 }
  0x73   : > { %745 = vmatprep.mubr.bf16.mxu0 %v1834_v28  ;;  %809 = vmatprep.mubr.bf16.mxu1 %v1836_v29 }
  0x7a   : > { %746 = vmatmul.mubr.bf16.gmra.mxu0 %v1838_v30  ;;  %810 = vmatmul.mubr.bf16.gmra.mxu1 %v1839_v31 }
  0x7b   : > { %753 = vmatprep.mubr.bf16.mxu0 %v1840_v32  ;;  %817 = vmatprep.mubr.bf16.mxu1 %v1842_v33 }
  0x82   : > { %754 = vmatmul.mubr.bf16.gmra.mxu0 %v1844_v34  ;;  %818 = vmatmul.mubr.bf16.gmra.mxu1 %v1845_v35 }
  0x83   : > { %761 = vmatprep.mubr.bf16.mxu0 %v1846_v36  ;;  %825 = vmatprep.mubr.bf16.mxu1 %v1848_v37 }
  0x8a   : > { %762 = vmatmul.mubr.bf16.gmra.mxu0 %v1850_v38  ;;  %826 = vmatmul.mubr.bf16.gmra.mxu1 %v1851_v39 }
  0x8b   : > { %769 = vmatprep.mubr.bf16.mxu0 %v1852_v40  ;;  %833 = vmatprep.mubr.bf16.mxu1 %v1854_v41 }
  0x92   : > { %770 = vmatmul.mubr.bf16.gmra.mxu0 %v1856_v42  ;;  %834 = vmatmul.mubr.bf16.gmra.mxu1 %v1857_v43 }
  0x93   : > { %777 = vmatprep.mubr.bf16.mxu0 %v1858_v44  ;;  %841 = vmatprep.mubr.bf16.mxu1 %v1860_v45 }
  0x9a   : > { %778 = vmatmul.mubr.bf16.gmra.mxu0 %v1862_v46  ;;  %842 = vmatmul.mubr.bf16.gmra.mxu1 %v1863_v47 }
 0x122   : > { %v1609_v48 = vpop.f32.mrf.mxu0  ;;  %v1657_v49 = vpop.f32.mrf.mxu1 }
 0x124   : > { %v1610_v50 = vpop.f32.mrf.mxu0  ;;  %v1658_v52 = vpop.f32.mrf.mxu1 }
 0x125   : > { %v1611_v53 = vadd.f32 %v1610_v50, %v1609_v48  ;;  %v1659_v54 = vadd.f32 %v1658_v52, %v1657_v49 }
 0x126   : > { %v1612_v55 = vpop.f32.mrf.mxu0  ;;  %v1660_v56 = vpop.f32.mrf.mxu1 }
 0x127   : > { %v956_v57 = vmul.f32 %v1611_v53, %v2202_v51  ;;  %v972_v58 = vmul.f32 %v1659_v54, %v2202_v51 }
 0x128   : > { %v1613_v60 = vpop.f32.mrf.mxu0  ;;  %v1661_v61 = vpop.f32.mrf.mxu1 }
 0x129   : > { %v1614_v62 = vadd.f32 %v1613_v60, %v1612_v55  ;;  %v1662_v63 = vadd.f32 %v1661_v61, %v1660_v56  ;;  %v995_v2 = vadd.f32 %v2209_v59, %v956_v57  ;;  %v1011_v3 = vadd.f32 %v2209_v59, %v972_v58 }
 0x12a   : > { %v1615_v0 = vpop.f32.mrf.mxu0  ;;  %v1663_v1 = vpop.f32.mrf.mxu1 }
 0x12b   : > { %v957_v4 = vmul.f32 %v1614_v62, %v2202_v51  ;;  %v973_v5 = vmul.f32 %v1662_v63, %v2202_v51  ;;  %v1027_v14 = vmax.f32 %v995_v2, 0.0  ;;  %v1043_v15 = vmax.f32 %v1011_v3, 0.0 }
 0x12c   : > { %v1616_v6 = vpop.f32.mrf.mxu0  ;;  %v1664_v7 = vpop.f32.mrf.mxu1 }
 0x12d   : > { %v996_v8 = vadd.f32 %v2209_v59, %v957_v4  ;;  %v1012_v9 = vadd.f32 %v2209_v59, %v973_v5  ;;  %v1617_v10 = vadd.f32 %v1616_v6, %v1615_v0  ;;  %v1665_v11 = vadd.f32 %v1664_v7, %v1663_v1 }
 0x12e   : > { %v1618_v12 = vpop.f32.mrf.mxu0  ;;  %v1666_v13 = vpop.f32.mrf.mxu1 }
 0x12f   : > { %v1028_v16 = vmax.f32 %v996_v8, 0.0  ;;  %v1044_v17 = vmax.f32 %v1012_v9, 0.0  ;;  %v958_v18 = vmul.f32 %v1617_v10, %v2202_v51  ;;  %v974_v19 = vmul.f32 %v1665_v11, %v2202_v51 }
 0x130   : > { %v1619_v20 = vpop.f32.mrf.mxu0  ;;  %v1667_v21 = vpop.f32.mrf.mxu1 }
 0x131   : > { %v1501_v22 = vpack.c.bf16 %v1028_v16, %v1027_v14  ;;  %v1541_v23 = vpack.c.bf16 %v1044_v17, %v1043_v15  ;;  %v1620_v24 = vadd.f32 %v1619_v20, %v1618_v12  ;;  %v1668_v25 = vadd.f32 %v1667_v21, %v1666_v13 }
 0x132   : > { %v1621_v26 = vpop.f32.mrf.mxu0  ;;  %v1669_v27 = vpop.f32.mrf.mxu1  ;;  %v997_v28 = vadd.f32 %v2209_v59, %v958_v18  ;;  %v1013_v29 = vadd.f32 %v2209_v59, %v974_v19 }
 0x133   : > { %1502 = vst [vmem:[%s2220_s9] sm:$0xff] %v1501_v22   ;;  %1585 = vst [vmem:[%s2220_s9 + $0x40] sm:$0xff] %v1541_v23   ;;  %v959_v30 = vmul.f32 %v1620_v24, %v2202_v51  ;;  %v975_v31 = vmul.f32 %v1668_v25, %v2202_v51 }
 0x134   : > { %v1622_v32 = vpop.f32.mrf.mxu0  ;;  %v1670_v33 = vpop.f32.mrf.mxu1  ;;  %v1029_v42 = vmax.f32 %v997_v28, 0.0  ;;  %v1045_v43 = vmax.f32 %v1013_v29, 0.0 }
 0x135   : > { %v1623_v34 = vadd.f32 %v1622_v32, %v1621_v26  ;;  %v1671_v35 = vadd.f32 %v1670_v33, %v1669_v27  ;;  %v998_v36 = vadd.f32 %v2209_v59, %v959_v30  ;;  %v1014_v37 = vadd.f32 %v2209_v59, %v975_v31 }
 0x136   : > { %v1624_v38 = vpop.f32.mrf.mxu0  ;;  %v1672_v39 = vpop.f32.mrf.mxu1 }
 0x137   : > { %v960_v40 = vmul.f32 %v1623_v34, %v2202_v51  ;;  %v976_v41 = vmul.f32 %v1671_v35, %v2202_v51  ;;  %v1030_v44 = vmax.f32 %v998_v36, 0.0  ;;  %v1046_v45 = vmax.f32 %v1014_v37, 0.0 }
 0x138   : > { %v1625_v46 = vpop.f32.mrf.mxu0  ;;  %v1673_v47 = vpop.f32.mrf.mxu1 }
 0x139   : > { %v1626_v48 = vadd.f32 %v1625_v46, %v1624_v38  ;;  %v1674_v49 = vadd.f32 %v1673_v47, %v1672_v39  ;;  %v1506_v50 = vpack.c.bf16 %v1030_v44, %v1029_v42  ;;  %v1546_v52 = vpack.c.bf16 %v1046_v45, %v1045_v43 }
 0x13a   : > { %v1627_v53 = vpop.f32.mrf.mxu0  ;;  %v1675_v54 = vpop.f32.mrf.mxu1  ;;  %v999_v55 = vadd.f32 %v2209_v59, %v960_v40  ;;  %v1015_v56 = vadd.f32 %v2209_v59, %v976_v41 }
 0x13b   : > { %v961_v57 = vmul.f32 %v1626_v48, %v2202_v51  ;;  %v977_v58 = vmul.f32 %v1674_v49, %v2202_v51  ;;  %1578 = vst [vmem:[%s2220_s9 + $0x8] sm:$0xff] %v1506_v50   ;;  %1586 = vst [vmem:[%s2220_s9 + $0x48] sm:$0xff] %v1546_v52  }
 0x13c   : > { %v1628_v60 = vpop.f32.mrf.mxu0  ;;  %v1676_v61 = vpop.f32.mrf.mxu1  ;;  %v1031_v4 = vmax.f32 %v999_v55, 0.0  ;;  %v1047_v5 = vmax.f32 %v1015_v56, 0.0 }
 0x13d   : > { %v1000_v62 = vadd.f32 %v2209_v59, %v961_v57  ;;  %v1016_v63 = vadd.f32 %v2209_v59, %v977_v58  ;;  %v1629_v0 = vadd.f32 %v1628_v60, %v1627_v53  ;;  %v1677_v1 = vadd.f32 %v1676_v61, %v1675_v54 }
 0x13e   : > { %v1630_v2 = vpop.f32.mrf.mxu0  ;;  %v1678_v3 = vpop.f32.mrf.mxu1 }
 0x13f   : > { %v1032_v6 = vmax.f32 %v1000_v62, 0.0  ;;  %v1048_v7 = vmax.f32 %v1016_v63, 0.0  ;;  %v962_v8 = vmul.f32 %v1629_v0, %v2202_v51  ;;  %v978_v9 = vmul.f32 %v1677_v1, %v2202_v51 }
 0x140   : > { %v1631_v10 = vpop.f32.mrf.mxu0  ;;  %v1679_v11 = vpop.f32.mrf.mxu1 }
 0x141   : > { %v1511_v12 = vpack.c.bf16 %v1032_v6, %v1031_v4  ;;  %v1551_v13 = vpack.c.bf16 %v1048_v7, %v1047_v5  ;;  %v1632_v14 = vadd.f32 %v1631_v10, %v1630_v2  ;;  %v1680_v15 = vadd.f32 %v1679_v11, %v1678_v3 }
 0x142   : > { %v1633_v16 = vpop.f32.mrf.mxu0  ;;  %v1681_v17 = vpop.f32.mrf.mxu1  ;;  %v1001_v18 = vadd.f32 %v2209_v59, %v962_v8  ;;  %v1017_v19 = vadd.f32 %v2209_v59, %v978_v9 }
 0x143   : > { %1579 = vst [vmem:[%s2220_s9 + $0x10] sm:$0xff] %v1511_v12   ;;  %1587 = vst [vmem:[%s2220_s9 + $0x50] sm:$0xff] %v1551_v13   ;;  %v963_v20 = vmul.f32 %v1632_v14, %v2202_v51  ;;  %v979_v21 = vmul.f32 %v1680_v15, %v2202_v51 }
 0x144   : > { %v1634_v22 = vpop.f32.mrf.mxu0  ;;  %v1682_v23 = vpop.f32.mrf.mxu1  ;;  %v1033_v32 = vmax.f32 %v1001_v18, 0.0  ;;  %v1049_v33 = vmax.f32 %v1017_v19, 0.0 }
 0x145   : > { %v1635_v24 = vadd.f32 %v1634_v22, %v1633_v16  ;;  %v1683_v25 = vadd.f32 %v1682_v23, %v1681_v17  ;;  %v1002_v26 = vadd.f32 %v2209_v59, %v963_v20  ;;  %v1018_v27 = vadd.f32 %v2209_v59, %v979_v21 }
 0x146   : > { %v1636_v28 = vpop.f32.mrf.mxu0  ;;  %v1684_v29 = vpop.f32.mrf.mxu1 }
 0x147   : > { %v964_v30 = vmul.f32 %v1635_v24, %v2202_v51  ;;  %v980_v31 = vmul.f32 %v1683_v25, %v2202_v51  ;;  %v1034_v34 = vmax.f32 %v1002_v26, 0.0  ;;  %v1050_v35 = vmax.f32 %v1018_v27, 0.0 }
 0x148   : > { %v1637_v36 = vpop.f32.mrf.mxu0  ;;  %v1685_v37 = vpop.f32.mrf.mxu1 }
 0x149   : > { %v1638_v38 = vadd.f32 %v1637_v36, %v1636_v28  ;;  %v1686_v39 = vadd.f32 %v1685_v37, %v1684_v29  ;;  %v1516_v40 = vpack.c.bf16 %v1034_v34, %v1033_v32  ;;  %v1556_v41 = vpack.c.bf16 %v1050_v35, %v1049_v33 }
 0x14a   : > { %v1639_v42 = vpop.f32.mrf.mxu0  ;;  %v1687_v43 = vpop.f32.mrf.mxu1  ;;  %v1003_v44 = vadd.f32 %v2209_v59, %v964_v30  ;;  %v1019_v45 = vadd.f32 %v2209_v59, %v980_v31 }
 0x14b   : > { %v965_v46 = vmul.f32 %v1638_v38, %v2202_v51  ;;  %v981_v47 = vmul.f32 %v1686_v39, %v2202_v51  ;;  %1580 = vst [vmem:[%s2220_s9 + $0x18] sm:$0xff] %v1516_v40   ;;  %1588 = vst [vmem:[%s2220_s9 + $0x58] sm:$0xff] %v1556_v41  }
 0x14c   : > { %v1640_v48 = vpop.f32.mrf.mxu0  ;;  %v1688_v49 = vpop.f32.mrf.mxu1  ;;  %v1035_v57 = vmax.f32 %v1003_v44, 0.0  ;;  %v1051_v58 = vmax.f32 %v1019_v45, 0.0 }
 0x14d   : > { %v1004_v50 = vadd.f32 %v2209_v59, %v965_v46  ;;  %v1020_v52 = vadd.f32 %v2209_v59, %v981_v47  ;;  %v1641_v53 = vadd.f32 %v1640_v48, %v1639_v42  ;;  %v1689_v54 = vadd.f32 %v1688_v49, %v1687_v43 }
 0x14e   : > { %v1642_v55 = vpop.f32.mrf.mxu0  ;;  %v1690_v56 = vpop.f32.mrf.mxu1 }
 0x14f   : > { %v1036_v60 = vmax.f32 %v1004_v50, 0.0  ;;  %v1052_v61 = vmax.f32 %v1020_v52, 0.0  ;;  %v966_v62 = vmul.f32 %v1641_v53, %v2202_v51  ;;  %v982_v63 = vmul.f32 %v1689_v54, %v2202_v51 }
 0x150   : > { %v1643_v0 = vpop.f32.mrf.mxu0  ;;  %v1691_v1 = vpop.f32.mrf.mxu1 }
 0x151   : > { %v1521_v2 = vpack.c.bf16 %v1036_v60, %v1035_v57  ;;  %v1561_v3 = vpack.c.bf16 %v1052_v61, %v1051_v58  ;;  %v1644_v4 = vadd.f32 %v1643_v0, %v1642_v55  ;;  %v1692_v5 = vadd.f32 %v1691_v1, %v1690_v56 }
 0x152   : > { %v1645_v6 = vpop.f32.mrf.mxu0  ;;  %v1693_v7 = vpop.f32.mrf.mxu1  ;;  %v1005_v8 = vadd.f32 %v2209_v59, %v966_v62  ;;  %v1021_v9 = vadd.f32 %v2209_v59, %v982_v63 }
 0x153   : > { %1581 = vst [vmem:[%s2220_s9 + $0x20] sm:$0xff] %v1521_v2   ;;  %1589 = vst [vmem:[%s2220_s9 + $0x60] sm:$0xff] %v1561_v3   ;;  %v967_v10 = vmul.f32 %v1644_v4, %v2202_v51  ;;  %v983_v11 = vmul.f32 %v1692_v5, %v2202_v51 }
 0x154   : > { %v1646_v12 = vpop.f32.mrf.mxu0  ;;  %v1694_v13 = vpop.f32.mrf.mxu1  ;;  %v1037_v22 = vmax.f32 %v1005_v8, 0.0  ;;  %v1053_v23 = vmax.f32 %v1021_v9, 0.0 }
 0x155   : > { %v1647_v14 = vadd.f32 %v1646_v12, %v1645_v6  ;;  %v1695_v15 = vadd.f32 %v1694_v13, %v1693_v7  ;;  %v1006_v16 = vadd.f32 %v2209_v59, %v967_v10  ;;  %v1022_v17 = vadd.f32 %v2209_v59, %v983_v11 }
 0x156   : > { %v1648_v18 = vpop.f32.mrf.mxu0  ;;  %v1696_v19 = vpop.f32.mrf.mxu1 }
 0x157   : > { %v968_v20 = vmul.f32 %v1647_v14, %v2202_v51  ;;  %v984_v21 = vmul.f32 %v1695_v15, %v2202_v51  ;;  %v1038_v24 = vmax.f32 %v1006_v16, 0.0  ;;  %v1054_v25 = vmax.f32 %v1022_v17, 0.0 }
 0x158   : > { %v1649_v26 = vpop.f32.mrf.mxu0  ;;  %v1697_v27 = vpop.f32.mrf.mxu1 }
 0x159   : > { %v1650_v28 = vadd.f32 %v1649_v26, %v1648_v18  ;;  %v1698_v29 = vadd.f32 %v1697_v27, %v1696_v19  ;;  %v1526_v30 = vpack.c.bf16 %v1038_v24, %v1037_v22  ;;  %v1566_v31 = vpack.c.bf16 %v1054_v25, %v1053_v23 }
 0x15a   : > { %v1651_v32 = vpop.f32.mrf.mxu0  ;;  %v1699_v33 = vpop.f32.mrf.mxu1  ;;  %v1007_v34 = vadd.f32 %v2209_v59, %v968_v20  ;;  %v1023_v35 = vadd.f32 %v2209_v59, %v984_v21 }
 0x15b   : > { %v969_v36 = vmul.f32 %v1650_v28, %v2202_v51  ;;  %v985_v37 = vmul.f32 %v1698_v29, %v2202_v51  ;;  %1582 = vst [vmem:[%s2220_s9 + $0x28] sm:$0xff] %v1526_v30   ;;  %1590 = vst [vmem:[%s2220_s9 + $0x68] sm:$0xff] %v1566_v31  }
 0x15c   : > { %v1652_v38 = vpop.f32.mrf.mxu0  ;;  %v1700_v39 = vpop.f32.mrf.mxu1  ;;  %v1039_v46 = vmax.f32 %v1007_v34, 0.0  ;;  %v1055_v47 = vmax.f32 %v1023_v35, 0.0 }
 0x15d   : > { %v1008_v40 = vadd.f32 %v2209_v59, %v969_v36  ;;  %v1024_v41 = vadd.f32 %v2209_v59, %v985_v37  ;;  %v1653_v42 = vadd.f32 %v1652_v38, %v1651_v32  ;;  %v1701_v43 = vadd.f32 %v1700_v39, %v1699_v33 }
 0x15e   : > { %v1654_v44 = vpop.f32.mrf.mxu0  ;;  %v1702_v45 = vpop.f32.mrf.mxu1 }
 0x15f   : > { %v1040_v48 = vmax.f32 %v1008_v40, 0.0  ;;  %v1056_v49 = vmax.f32 %v1024_v41, 0.0  ;;  %v970_v50 = vmul.f32 %v1653_v42, %v2202_v51  ;;  %v986_v52 = vmul.f32 %v1701_v43, %v2202_v51 }
 0x160   : > { %v1655_v53 = vpop.f32.mrf.mxu0  ;;  %v1703_v54 = vpop.f32.mrf.mxu1 }
 0x161   : > { %v1531_v55 = vpack.c.bf16 %v1040_v48, %v1039_v46  ;;  %v1571_v56 = vpack.c.bf16 %v1056_v49, %v1055_v47  ;;  %v1656_v57 = vadd.f32 %v1655_v53, %v1654_v44  ;;  %v1704_v58 = vadd.f32 %v1703_v54, %v1702_v45 }
 0x162   : > { %v1009_v60 = vadd.f32 %v2209_v59, %v970_v50  ;;  %v1025_v61 = vadd.f32 %v2209_v59, %v986_v52 }
 0x163   : > { %1583 = vst [vmem:[%s2220_s9 + $0x30] sm:$0xff] %v1531_v55   ;;  %1591 = vst [vmem:[%s2220_s9 + $0x70] sm:$0xff] %v1571_v56   ;;  %v971_v62 = vmul.f32 %v1656_v57, %v2202_v51  ;;  %v987_v63 = vmul.f32 %v1704_v58, %v2202_v51 }
 0x164   : > { %v1041_v2 = vmax.f32 %v1009_v60, 0.0  ;;  %v1057_v3 = vmax.f32 %v1025_v61, 0.0 }
 0x165   : > { %v1010_v0 = vadd.f32 %v2209_v59, %v971_v62  ;;  %v1026_v1 = vadd.f32 %v2209_v59, %v987_v63 }
 0x167   : > { %v1042_v4 = vmax.f32 %v1010_v0, 0.0  ;;  %v1058_v5 = vmax.f32 %v1026_v1, 0.0 }
 0x169   : > { %v1536_v51 = vpack.c.bf16 %v1042_v4, %v1041_v2  ;;  %v1576_v6 = vpack.c.bf16 %v1058_v5, %v1057_v3 }
 0x16b   : > { %1584 = vst [vmem:[%s2220_s9 + $0x38] sm:$0xff] %v1536_v51   ;;  %1592 = vst [vmem:[%s2220_s9 + $0x78] sm:$0xff] %v1576_v6  }
 0x16c   : > { %1931 = shalt.err (!%p1928_p5)
}
 0x16d   : > { %s1932_s6 = scalar_lea.hbm %s2295_s29, 2048  ;;  %s1936_s27 = scalar_lea.hbm %s2351_s4, 4096 }
 0x16e   : > { %p1933_p7 = scmp.ne.s32.totalorder %s2295_s29, %s1932_s6  ;;  %p1937_p9 = scmp.lt.s32.totalorder %s2295_s29, %s2351_s4 }
 0x16f   : > { %p1938_p11 = scmp.lt.s32.totalorder %s1936_s27, %s1932_s6 }
 0x170   : > { %p1934_p6 = pnand %p1933_p7, %p2125_p13 }
 0x171   : > { %p1939_p12 = por %p1938_p11, %p1937_p9 }
 0x172   : > { %p1935_p4 = pneg %p1934_p6 }
 0x174   : > { %p1940_p1 = pnand %p1939_p12, %p1935_p4 }
 0x176   : > { %1943 = shalt.err (!%p1940_p1)
}
 0x177   : > { %s2011_s9 = smov 64   ;;  %s2012_s24 = smov 4  }
 0x178   : > { %1727 = dma.vmem_to_hbm [thread:$0]  (%p2125_p13), %s2297_s10, 2048, %s2295_s29, %s1220_s18, %s2011_s9, %s2011_s9, %s2012_s24  }
 0x179 PF: > { %s1249_s14 = sand.u32 1, %s1982_s15   ;;  %p2365_p8 = scmp.ne.s32.totalorder %s2357_s26, 0 }
 0x17a   : > { %p2366_p10 = scmp.ge.s32.totalorder %s2002_s20, 2  ;;  %s1250_s11 = scalar_lea.sflag [#allocation5], %s1249_s14 }
 0x17c   : > { %p1738_p0 = pnand %p2366_p10, %p2365_p8 }
 0x17e   : > { %p1739_p2 = pneg %p1738_p0 }
 0x180   : > { %1977 = dma.done.wait (%p1739_p2), %s1250_s11, 2048  }
 0x181   : > { %1979 = vsyncadd (%p1739_p2), %s1250_s11, 4294965248  ;;  %s21_s20 = sadd.s32 1, %s2002_s20   ;;  %s2367_s15 = smov %s1986_s16 }
 0x182   : > { %p18_p3 = scmp.ge.s32.totalorder %s21_s20, 4   ;;  %s2368_s16 = smov %s1990_s17 }
 0x183   : > { %s2369_s17 = smov %s2134_s28  ;;  %s2370_s18 = smov %s1998_s19 }
 0x184   : > { %s2371_s19 = smov %s2373_s5  ;;  %20 = sbr.rel (!%p18_p3) target bundleno = 9 (0x9), region = 100 }
 0x189   :  { %1255 = vsyncpa [#allocation4], 1 }
 0x18a   :  { %1257 = vsyncpa [#allocation4 + $0x1], 1 }
 0x18b   :  { %1258 = vsyncpa [#allocation7], 1 }
 0x18c   :  { %1259 = vsyncpa [#allocation5], 1 }
 0x18d   :  { %1261 = vsyncpa [#allocation5 + $0x1], 1 }

</bundles_post_ra>
